<compile_context>
chip_gen: v7x
topology: tpu7x:2x2x1
jax: 0.10.0
libtpu: 0.0.40
codegen_flags: <defaults>
</compile_context>

<pallas_src>
import jax
import jax.numpy as jnp
from jax.experimental import pallas as pl
from jax.experimental.pallas import tpu as pltpu


def _round_up(x, m):
    return (x + m - 1) // m * m


# ----------------------------------------------------------------------------
# Pallas kernel: out = relu(patches @ w_scaled + shift)
#   BN scale is pre-folded into w_scaled; conv-bias + BN shift into `shift`.
#   patches/w are bf16, accumulation + epilogue are f32.
# ----------------------------------------------------------------------------
def _matmul_bias_relu_kernel(p_ref, w_ref, b_ref, o_ref):
    acc = jnp.dot(p_ref[...], w_ref[...], preferred_element_type=jnp.float32)
    o_ref[...] = jnp.maximum(acc + b_ref[...], 0.0)


def fused_conv_bn_relu_matmul(patches_bf16, w_bf16, shift_f32):
    """patches: (M, K) bf16, w: (K, N) bf16, shift: (1, N) f32 -> (M, N) f32."""
    M, K = patches_bf16.shape
    _, N = w_bf16.shape

    # M-tile: multiple of 8, big enough to amortize the ~0.35us/step overhead,
    # small enough (<= 1024) that double-buffered tiles use only a few MiB of
    # VMEM on every TPU generation (safe on v7x's 64 MiB).
    TM = min(1024, _round_up(M, 8))
    M_pad = _round_up(M, TM)
    if M_pad != M:
        patches_bf16 = jnp.pad(patches_bf16, ((0, M_pad - M), (0, 0)))

    cost = pl.CostEstimate(
        flops=2 * M_pad * K * N,
        transcendentals=0,
        bytes_accessed=(M_pad * K * 2 + K * N * 2 + N * 4 + M_pad * N * 4),
    )

    out = pl.pallas_call(
        _matmul_bias_relu_kernel,
        out_shape=jax.ShapeDtypeStruct((M_pad, N), jnp.float32),
        grid_spec=pl.GridSpec(
            grid=(M_pad // TM,),
            in_specs=[
                pl.BlockSpec((TM, K), lambda i: (i, 0)),   # patches row-tile
                pl.BlockSpec((K, N), lambda i: (0, 0)),    # scaled weights
                pl.BlockSpec((1, N), lambda i: (0, 0)),    # shift
            ],
            out_specs=pl.BlockSpec((TM, N), lambda i: (i, 0)),
        ),
        compiler_params=pltpu.CompilerParams(
            dimension_semantics=("parallel",),  # independent M-tiles -> 2 TCs on v7x
            vmem_limit_bytes=32 * 1024 * 1024,
        ),
        cost_estimate=cost,
    )(patches_bf16, w_bf16, shift_f32)
    return out[:M] if M_pad != M else out


# ----------------------------------------------------------------------------
# Glue: im2col for a 3x3 conv with padding=1 and given stride (plain JAX,
# done in bf16 to halve HBM traffic of the 9x-duplicated activations).
# Patch channel order is (kh, kw, c_in) — matches the HWIO weight reshape.
# ----------------------------------------------------------------------------
def im2col_3x3(x_nhwc, stride):
    B, H, W, C = x_nhwc.shape
    xp = jnp.pad(x_nhwc, ((0, 0), (1, 1), (1, 1), (0, 0)))
    H_out = (H + 2 - 3) // stride + 1
    W_out = (W + 2 - 3) // stride + 1
    cols = []
    for kh in range(3):
        for kw in range(3):
            cols.append(
                xp[:, kh:kh + stride * H_out:stride,
                      kw:kw + stride * W_out:stride, :])
    patches = jnp.concatenate(cols, axis=-1)  # (B, H_out, W_out, 9*C)
    return patches.reshape(B * H_out * W_out, 9 * C), H_out, W_out


def conv3x3_bn_relu(x_nhwc, layer_params, stride, eps=1e-5):
    """One Conv2d(3x3, pad=1, stride) + BatchNorm2d(eval) + ReLU layer."""
    w_hwio, conv_b, gamma, beta, run_mean, run_var = layer_params
    B = x_nhwc.shape[0]
    Cin = x_nhwc.shape[-1]
    Cout = w_hwio.shape[-1]

    patches, Ho, Wo = im2col_3x3(x_nhwc.astype(jnp.bfloat16), stride)

    # Fold BN scale into the weights (tiny (K,N) constant fold in XLA);
    # fold conv bias + BN shift into a single per-channel shift.
    scale = gamma / jnp.sqrt(run_var + eps)                     # (Cout,)
    shift = (conv_b - run_mean) * scale + beta                  # (Cout,)
    w_flat = w_hwio.reshape(9 * Cin, Cout) * scale[None, :]     # (K, Cout)

    # Pad K = 9*Cin to a multiple of 8 (27 -> 32 for the Cin=3 first layer).
    K = 9 * Cin
    K_pad = _round_up(K, 8)
    if K_pad != K:
        patches = jnp.pad(patches, ((0, 0), (0, K_pad - K)))
        w_flat = jnp.pad(w_flat, ((0, K_pad - K), (0, 0)))

    out = fused_conv_bn_relu_matmul(
        patches.astype(jnp.bfloat16),
        w_flat.astype(jnp.bfloat16),
        shift.reshape(1, Cout).astype(jnp.float32),
    )
    return out.reshape(B, Ho, Wo, Cout)


# ----------------------------------------------------------------------------
# PatchEmbed forward (kernel_size=7 branch: 3 conv-BN-ReLU stages).
# ----------------------------------------------------------------------------
def patch_embed_forward(x_nchw, params):
    x = jnp.transpose(x_nchw, (0, 2, 3, 1))          # NCHW -> NHWC
    x = conv3x3_bn_relu(x, params[0], stride=2)       # in_chans -> 32
    x = conv3x3_bn_relu(x, params[1], stride=1)       # 32 -> 32
    x = conv3x3_bn_relu(x, params[2], stride=2)       # 32 -> embed_dim
    B, H, W, C = x.shape
    tokens = x.reshape(B, H * W, C)                   # == flatten(2).transpose(1,2)
    return tokens, (H, W)


# Pure-JAX f32 reference (lax conv) for numerical sanity checking.
def reference_forward(x_nchw, params, eps=1e-5):
    x = jnp.transpose(x_nchw, (0, 2, 3, 1))
    for p, s in zip(params, (2, 1, 2)):
        w, b, gamma, beta, mean, var = p
        x = jax.lax.conv_general_dilated(
            x, w, window_strides=(s, s), padding=((1, 1), (1, 1)),
            dimension_numbers=("NHWC", "HWIO", "NHWC"))
        x = (x + b - mean) / jnp.sqrt(var + eps) * gamma + beta
        x = jnp.maximum(x, 0.0)
    B, H, W, C = x.shape
    return x.reshape(B, H * W, C), (H, W)


def init_layer_params(key, c_in, c_out):
    k = jax.random.split(key, 6)
    w_hwio = 0.1 * jax.random.normal(k[0], (3, 3, c_in, c_out), jnp.float32)
    conv_b = 0.05 * jax.random.normal(k[1], (c_out,), jnp.float32)
    gamma = 0.5 + jax.random.uniform(k[2], (c_out,), jnp.float32)
    beta = 0.1 * jax.random.normal(k[3], (c_out,), jnp.float32)
    run_mean = 0.1 * jax.random.normal(k[4], (c_out,), jnp.float32)
    run_var = 0.5 + jax.random.uniform(k[5], (c_out,), jnp.float32)
    return (w_hwio, conv_b, gamma, beta, run_mean, run_var)


if __name__ == "__main__":
    # Small shapes consistent with PatchEmbed(kernel_size=7):
    #   img_size=16, in_chans=3, embed_dim=32, batch=2.
    B, C_IN, IMG = 2, 3, 16
    HIDDEN = 32          # hardcoded 32 in the kernel_size==7 branch
    EMBED_DIM = 32

    key = jax.random.PRNGKey(0)
    k_x, k0, k1, k2 = jax.random.split(key, 4)

    x = jax.random.normal(k_x, (B, C_IN, IMG, IMG), jnp.float32)   # NCHW

    params = [
        init_layer_params(k0, C_IN, HIDDEN),       # Conv 3->32, stride 2
        init_layer_params(k1, HIDDEN, HIDDEN),     # Conv 32->32, stride 1
        init_layer_params(k2, HIDDEN, EMBED_DIM),  # Conv 32->embed, stride 2
    ]

    tokens, (H, W) = patch_embed_forward(x, params)
    jax.block_until_ready(tokens)

    assert tokens.shape == (B, H * W, EMBED_DIM), tokens.shape
    assert (H, W) == (IMG // 4, IMG // 4), (H, W)

    # Numerical check vs. f32 lax.conv reference (loose tol: bf16 MXU inputs).
    ref_tokens, (Hr, Wr) = reference_forward(x, params)
    assert (Hr, Wr) == (H, W)
    max_err = float(jnp.max(jnp.abs(tokens - ref_tokens)))
    assert max_err < 1e-1, f"max abs error vs reference: {max_err}"

    print("KERNEL_OK")
</pallas_src>

<mosaic_0001>
module attributes {stable_mosaic.version = 11 : i64} {
  func.func @_matmul_bias_relu_kernel(%arg0: i32, %arg1: memref<128x32xbf16, #tpu.memory_space<vmem>>, %arg2: memref<32x32xbf16, #tpu.memory_space<vmem>>, %arg3: memref<1x32xf32, #tpu.memory_space<vmem>>, %arg4: memref<128x32xf32, #tpu.memory_space<vmem>>) attributes {dimension_semantics = [#tpu.dimension_semantics<parallel>], iteration_bounds = array<i64: 1>, scalar_prefetch = 0 : i64, scratch_operands = 0 : i64, tpu.core_type = #tpu.core_type<tc>, window_params = [{transform_indices = @transform_0, window_bounds = array<i64: 128, 32>}, {pipeline_mode = #tpu.pipeline_mode<synchronous>, transform_indices = @transform_1, window_bounds = array<i64: 32, 32>}, {pipeline_mode = #tpu.pipeline_mode<synchronous>, transform_indices = @transform_2, window_bounds = array<i64: 1, 32>}, {transform_indices = @transform_3, window_bounds = array<i64: 128, 32>}]} {
    %c0 = arith.constant 0 : index
    %c0_0 = arith.constant 0 : index
    %0 = vector.load %arg1[%c0, %c0_0] : memref<128x32xbf16, #tpu.memory_space<vmem>>, vector<128x32xbf16>
    %c0_1 = arith.constant 0 : index
    %c0_2 = arith.constant 0 : index
    %1 = vector.load %arg2[%c0_1, %c0_2] : memref<32x32xbf16, #tpu.memory_space<vmem>>, vector<32x32xbf16>
    %cst = arith.constant dense<0.000000e+00> : vector<128x32xf32>
    %2 = tpu.matmul %0, %1, %cst {dimension_numbers = #tpu.dot_dimension_numbers<[1], [0], [0], [1], [0, 0, 1, 1], [], []>} : vector<128x32xbf16>, vector<32x32xbf16>, vector<128x32xf32> -> vector<128x32xf32>
    %c0_3 = arith.constant 0 : index
    %c0_4 = arith.constant 0 : index
    %3 = vector.load %arg3[%c0_3, %c0_4] : memref<1x32xf32, #tpu.memory_space<vmem>>, vector<1x32xf32>
    %4 = vector.broadcast %3 : vector<1x32xf32> to vector<128x32xf32>
    %5 = arith.addf %2, %4 : vector<128x32xf32>
    %cst_5 = arith.constant 0.000000e+00 : f32
    %6 = vector.broadcast %cst_5 : f32 to vector<128x32xf32>
    %7 = arith.maximumf %5, %6 : vector<128x32xf32>
    %c0_6 = arith.constant 0 : index
    %c0_7 = arith.constant 0 : index
    %8 = vector.load %arg4[%c0_6, %c0_7] : memref<128x32xf32, #tpu.memory_space<vmem>>, vector<128x32xf32>
    tpu.vector_store %arg4[%c0_6, %c0_7], %7 {strides = array<i32>} : memref<128x32xf32, #tpu.memory_space<vmem>>, vector<128x32xf32>,
    return
  }
  func.func @transform_0(%arg0: i32) -> (i32, i32) {
    %c0_i32 = arith.constant 0 : i32
    %c0_i32_0 = arith.constant 0 : i32
    return %arg0, %c0_i32 : i32, i32
  }
  func.func @transform_1(%arg0: i32) -> (i32, i32) {
    %c0_i32 = arith.constant 0 : i32
    %c0_i32_0 = arith.constant 0 : i32
    %c0_i32_1 = arith.constant 0 : i32
    return %c0_i32, %c0_i32_0 : i32, i32
  }
  func.func @transform_2(%arg0: i32) -> (i32, i32) {
    %c0_i32 = arith.constant 0 : i32
    %c0_i32_0 = arith.constant 0 : i32
    %c0_i32_1 = arith.constant 0 : i32
    return %c0_i32, %c0_i32_0 : i32, i32
  }
  func.func @transform_3(%arg0: i32) -> (i32, i32) {
    %c0_i32 = arith.constant 0 : i32
    %c0_i32_0 = arith.constant 0 : i32
    return %arg0, %c0_i32 : i32, i32
  }
}

</mosaic_0001>

<bundles_post_ra>
// kernel: tpu_custom_call.1
= control target key start
LH: loop header
LB: loop body
LE: loop exit
PB: predicated region body
PF: predicated region fallthrough
CT: control target
= control target key end

     0   :  { %vm94_vm0 = vcmask 261120   ;;  %s440_s1 = inlined_call_operand.vmem [shape: bf16[32,32], index: 1, kind: input, shape index: {}]   ;;  %s441_s0 = inlined_call_operand.vmem [shape: bf16[128,32], index: 0, kind: input, shape index: {}]   ;;  %s442_s2 = inlined_call_operand.vmem [shape: f32[1,32], index: 2, kind: input, shape index: {}]   ;;  %s443_s3 = inlined_call_operand.vmem [shape: f32[128,32], index: 3, kind: output, shape index: {}]  }
   0x1   :  { %v305_v0 = vld [vmem:[%s440_s1] sm:$0xff]   ;;  %v306_v1 = vld [vmem:[%s440_s1 + $0x8] sm:$0xff]   ;;  %v311_v6 = vld [vmem:[%s441_s0 + $0x10] sm:$0xff]  }
   0x2   :  { %281 = vmatprep.subr.bf16.mxu0 %v305_v0  ;;  %301 = vmatprep.subr.bf16.mxu1 %v305_v0  ;;  %v307_v2 = vld [vmem:[%s441_s0] sm:$0xff]   ;;  %v309_v4 = vld [vmem:[%s441_s0 + $0x8] sm:$0xff]   ;;  %v312_v7 = vld [vmem:[%s441_s0 + $0x30] sm:$0xff]  }
   0x3   :  { %282 = vmatpush3.bf16.msra.mxu0 %v305_v0  ;;  %303 = vmatpush3.bf16.msra.mxu1 %v305_v0  ;;  %v308_v3 = vld [vmem:[%s441_s0 + $0x20] sm:$0xff]   ;;  %v310_v5 = vld [vmem:[%s441_s0 + $0x28] sm:$0xff]   ;;  %v313_v8 = vld [vmem:[%s441_s0 + $0x18] sm:$0xff]  }
   0x4   :  { %283 = vmatprep.subr.bf16.mxu0 %v306_v1  ;;  %302 = vmatprep.subr.bf16.mxu1 %v306_v1  ;;  %v314_v9 = vld [vmem:[%s441_s0 + $0x38] sm:$0xff]   ;;  %v252_v10 = vld [vmem:[%s442_s2] ss:$0 sm:$0xff] }
   0x5   :  { %285 = vmatprep.mubr.msk.bf16.mxu0 %vm94_vm0, %v307_v2  ;;  %293 = vmatprep.mubr.msk.bf16.mxu1 %vm94_vm0, %v308_v3 }
   0x7   :  { %284 = vmatpush3.bf16.msra.mxu0 %v306_v1  ;;  %304 = vmatpush3.bf16.msra.mxu1 %v306_v1 }
   0xa   :  { %286 = vmatmul.mubr.msk.bf16.vlgmr.msra.gmra.mrb[0].mxu0 %vm94_vm0, %v309_v4  ;;  %294 = vmatmul.mubr.msk.bf16.vlgmr.msra.gmra.mrb[0].mxu1 %vm94_vm0, %v310_v5 }
   0xb   :  { %289 = vmatprep.mubr.msk.bf16.mxu0 %vm94_vm0, %v311_v6  ;;  %297 = vmatprep.mubr.msk.bf16.mxu1 %vm94_vm0, %v312_v7 }
  0x12   :  { %290 = vmatmul.mubr.msk.bf16.gmra.mrb[4].mxu0 %vm94_vm0, %v313_v8  ;;  %298 = vmatmul.mubr.msk.bf16.gmra.mrb[4].mxu1 %vm94_vm0, %v314_v9 }
  0xdd   :  { %v287_v11 = vpop.f32.mrb[0].mxu0  ;;  %v295_v12 = vpop.f32.mrb[0].mxu1 }
  0xde   :  { %v162_v13 = vadd.f32 %v287_v11, %v252_v10  ;;  %v194_v14 = vadd.f32 %v295_v12, %v252_v10  ;;  %v153_v15 = vpop.f32.mrb[1].mxu0  ;;  %v185_v16 = vpop.f32.mrb[1].mxu1 }
  0xdf   :  { %v154_v17 = vadd.f32 %v252_v10, %v153_v15  ;;  %v186_v18 = vadd.f32 %v252_v10, %v185_v16  ;;  %v288_v19 = vpop.f32.mrb[2].mxu0  ;;  %v296_v20 = vpop.f32.mrb[2].mxu1 }
  0xe0   :  { %v218_v21 = vmax.f32 %v162_v13, 0.0  ;;  %v226_v22 = vmax.f32 %v194_v14, 0.0  ;;  %v165_v23 = vadd.f32 %v288_v19, %v252_v10  ;;  %v197_v24 = vadd.f32 %v296_v20, %v252_v10  ;;  %v156_v25 = vpop.f32.mrb[3].mxu0  ;;  %v188_v26 = vpop.f32.mrb[3].mxu1 }
  0xe1   :  { %v216_v27 = vmax.f32 %v154_v17, 0.0  ;;  %v224_v28 = vmax.f32 %v186_v18, 0.0  ;;  %v157_v29 = vadd.f32 %v252_v10, %v156_v25  ;;  %v189_v30 = vadd.f32 %v252_v10, %v188_v26 }
  0xe2   :  { %234 = vst.msk [vmem:[%s443_s3 + $0x10] sm:$0xff] %vm94_vm0, %v218_v21  ;;  %242 = vst.msk [vmem:[%s443_s3 + $0x50] sm:$0xff] %vm94_vm0, %v226_v22  ;;  %v219_v31 = vmax.f32 %v165_v23, 0.0  ;;  %v227_v32 = vmax.f32 %v197_v24, 0.0 }
  0xe3   :  { %232 = vst.msk [vmem:[%s443_s3] sm:$0xff] %vm94_vm0, %v216_v27  ;;  %240 = vst.msk [vmem:[%s443_s3 + $0x40] sm:$0xff] %vm94_vm0, %v224_v28  ;;  %v217_v33 = vmax.f32 %v157_v29, 0.0  ;;  %v225_v34 = vmax.f32 %v189_v30, 0.0 }
  0xe4   :  { %235 = vst.msk [vmem:[%s443_s3 + $0x18] sm:$0xff] %vm94_vm0, %v219_v31  ;;  %243 = vst.msk [vmem:[%s443_s3 + $0x58] sm:$0xff] %vm94_vm0, %v227_v32 }
  0xe5   :  { %233 = vst.msk [vmem:[%s443_s3 + $0x8] sm:$0xff] %vm94_vm0, %v217_v33  ;;  %241 = vst.msk [vmem:[%s443_s3 + $0x48] sm:$0xff] %vm94_vm0, %v225_v34  ;;  %v291_v35 = vpop.f32.mrb[4].mxu0  ;;  %v299_v36 = vpop.f32.mrb[4].mxu1 }
  0xe6   :  { %v178_v37 = vadd.f32 %v291_v35, %v252_v10  ;;  %v210_v38 = vadd.f32 %v299_v36, %v252_v10  ;;  %v169_v39 = vpop.f32.mrb[5].mxu0  ;;  %v201_v40 = vpop.f32.mrb[5].mxu1 }
  0xe7   :  { %v170_v41 = vadd.f32 %v252_v10, %v169_v39  ;;  %v202_v42 = vadd.f32 %v252_v10, %v201_v40  ;;  %v292_v43 = vpop.f32.mrb[6].mxu0  ;;  %v300_v44 = vpop.f32.mrb[6].mxu1 }
  0xe8   :  { %v222_v45 = vmax.f32 %v178_v37, 0.0  ;;  %v230_v46 = vmax.f32 %v210_v38, 0.0  ;;  %v181_v47 = vadd.f32 %v292_v43, %v252_v10  ;;  %v213_v48 = vadd.f32 %v300_v44, %v252_v10  ;;  %v172_v49 = vpop.f32.mrb[7].mxu0  ;;  %v204_v50 = vpop.f32.mrb[7].mxu1 }
  0xe9   :  { %v220_v51 = vmax.f32 %v170_v41, 0.0  ;;  %v228_v52 = vmax.f32 %v202_v42, 0.0  ;;  %v173_v53 = vadd.f32 %v252_v10, %v172_v49  ;;  %v205_v54 = vadd.f32 %v252_v10, %v204_v50 }
  0xea   :  { %238 = vst.msk [vmem:[%s443_s3 + $0x30] sm:$0xff] %vm94_vm0, %v222_v45  ;;  %246 = vst.msk [vmem:[%s443_s3 + $0x70] sm:$0xff] %vm94_vm0, %v230_v46  ;;  %v223_v55 = vmax.f32 %v181_v47, 0.0  ;;  %v231_v56 = vmax.f32 %v213_v48, 0.0 }
  0xeb   :  { %236 = vst.msk [vmem:[%s443_s3 + $0x20] sm:$0xff] %vm94_vm0, %v220_v51  ;;  %244 = vst.msk [vmem:[%s443_s3 + $0x60] sm:$0xff] %vm94_vm0, %v228_v52  ;;  %v221_v57 = vmax.f32 %v173_v53, 0.0  ;;  %v229_v58 = vmax.f32 %v205_v54, 0.0 }
  0xec   :  { %239 = vst.msk [vmem:[%s443_s3 + $0x38] sm:$0xff] %vm94_vm0, %v223_v55  ;;  %247 = vst.msk [vmem:[%s443_s3 + $0x78] sm:$0xff] %vm94_vm0, %v231_v56 }
  0xed   :  { %237 = vst.msk [vmem:[%s443_s3 + $0x28] sm:$0xff] %vm94_vm0, %v221_v57  ;;  %245 = vst.msk [vmem:[%s443_s3 + $0x68] sm:$0xff] %vm94_vm0, %v229_v58 }

</bundles_post_ra>
